<compile_context>
chip_gen: v5e
topology: v5e:2x2
jax: 0.10.0
libtpu: 0.0.40
codegen_flags: <defaults>
</compile_context>

<pallas_src>
import math

import jax
import jax.numpy as jnp
from jax.experimental import pallas as pl
from jax.experimental.pallas import tpu as pltpu

HIGHEST = jax.lax.Precision.HIGHEST


def _round_up(x, m):
    return ((x + m - 1) // m) * m


# ----------------------------- Pallas kernels ------------------------------- #

def _resnet_block_kernel_shortcut(x_ref, w0_ref, b0_ref, w1_ref, b1_ref, ws_ref, o_ref):
    """size_in != size_out: shortcut is a bias-free Linear.
    x_ref : (TM, size_in)        w0_ref: (size_in, size_h)   b0_ref: (1, size_h)
    w1_ref: (size_h, size_out)   b1_ref: (1, size_out)       ws_ref: (size_in, size_out)
    o_ref : (TM, size_out)
    """
    x = x_ref[...]
    h = jnp.maximum(x, 0.0)                                   # relu(x)
    net = jnp.dot(h, w0_ref[...], preferred_element_type=jnp.float32,
                  precision=HIGHEST) + b0_ref[...]
    net = jnp.maximum(net, 0.0)                               # relu(net)
    dx = jnp.dot(net, w1_ref[...], preferred_element_type=jnp.float32,
                 precision=HIGHEST) + b1_ref[...]
    x_s = jnp.dot(x, ws_ref[...], preferred_element_type=jnp.float32,
                  precision=HIGHEST)                          # shortcut Linear
    o_ref[...] = dx + x_s


def _resnet_block_kernel_identity(x_ref, w0_ref, b0_ref, w1_ref, b1_ref, o_ref):
    """size_in == size_out: shortcut is the identity (direct, exact add)."""
    x = x_ref[...]
    h = jnp.maximum(x, 0.0)
    net = jnp.dot(h, w0_ref[...], preferred_element_type=jnp.float32,
                  precision=HIGHEST) + b0_ref[...]
    net = jnp.maximum(net, 0.0)
    dx = jnp.dot(net, w1_ref[...], preferred_element_type=jnp.float32,
                 precision=HIGHEST) + b1_ref[...]
    o_ref[...] = dx + x


# ------------------------------ tiling heuristic ----------------------------- #

def _num_tensorcores():
    """2 TensorCores per chip on v7x; v5e/v6e expose a single TC per device."""
    try:
        kind = jax.devices()[0].device_kind.lower()
    except Exception:
        return 1
    return 2 if "v7" in kind else 1


def _choose_tm(M, size_in, size_out, size_h):
    """Largest row tile that fits a conservative VMEM budget (double-buffered tiles),
    with an even number of 'parallel' steps on 2-TC chips."""
    per_row = 4 * 2 * (size_in + size_out)                    # x tile + out tile, 2 bufs
    weights = 4 * 2 * (size_in * size_h + size_h + size_h * size_out + size_out
                       + size_in * size_out)                  # resident params, 2 bufs
    budget = 24 * 1024 * 1024                                 # under the 32 MiB scoped limit
    tm_max = max(8, min(2048, ((budget - weights) // per_row) // 8 * 8))

    n_tc = _num_tensorcores()
    if M <= tm_max * n_tc:
        tm = _round_up(pl.cdiv(M, n_tc), 8)                   # one big step per TensorCore
    else:
        steps = pl.cdiv(M, tm_max)
        if n_tc > 1:
            steps = _round_up(steps, n_tc)                    # even step count on v7x
        tm = _round_up(pl.cdiv(M, steps), 8)
    return max(8, min(tm, tm_max))


# --------------------------------- wrapper ----------------------------------- #

@jax.jit
def resnet_block_fc(x, params):
    """x: (..., size_in) float32.
    params: w0 (in,h), b0 (1,h), w1 (h,out), b1 (1,out), optional ws (in,out)."""
    w0, b0, w1, b1 = params["w0"], params["b0"], params["w1"], params["b1"]
    ws = params.get("ws", None)
    size_in, size_h = w0.shape
    size_out = w1.shape[1]

    lead = x.shape[:-1]
    M = max(1, math.prod(lead))
    x2 = x.reshape(M, size_in)                 # metadata-only reshape, no HBM pass

    tm = _choose_tm(M, size_in, size_out, size_h)
    grid = (pl.cdiv(M, tm),)                   # ragged last block handled by Pallas

    flops = 2 * M * (size_in * size_h + size_h * size_out
                     + (0 if ws is None else size_in * size_out))
    bytes_acc = 4 * (M * size_in + M * size_out
                     + size_in * size_h + size_h + size_h * size_out + size_out
                     + (0 if ws is None else size_in * size_out))
    cost = pl.CostEstimate(flops=flops, transcendentals=0, bytes_accessed=bytes_acc)

    row_in_spec = pl.BlockSpec((tm, size_in), lambda i: (i, 0))
    row_out_spec = pl.BlockSpec((tm, size_out), lambda i: (i, 0))
    # Grid-invariant parameters: whole array resident in VMEM for every step.
    w0_spec = pl.BlockSpec((size_in, size_h), lambda i: (0, 0))
    b0_spec = pl.BlockSpec((1, size_h), lambda i: (0, 0))
    w1_spec = pl.BlockSpec((size_h, size_out), lambda i: (0, 0))
    b1_spec = pl.BlockSpec((1, size_out), lambda i: (0, 0))

    cparams = pltpu.CompilerParams(
        dimension_semantics=("parallel",),
        vmem_limit_bytes=32 * 1024 * 1024,     # safe on v5e/v6e (128 MiB) and v7x (64 MiB)
    )

    if ws is None:
        out = pl.pallas_call(
            _resnet_block_kernel_identity,
            out_shape=jax.ShapeDtypeStruct((M, size_out), jnp.float32),
            grid=grid,
            in_specs=[row_in_spec, w0_spec, b0_spec, w1_spec, b1_spec],
            out_specs=row_out_spec,
            compiler_params=cparams,
            cost_estimate=cost,
        )(x2, w0, b0, w1, b1)
    else:
        ws_spec = pl.BlockSpec((size_in, size_out), lambda i: (0, 0))
        out = pl.pallas_call(
            _resnet_block_kernel_shortcut,
            out_shape=jax.ShapeDtypeStruct((M, size_out), jnp.float32),
            grid=grid,
            in_specs=[row_in_spec, w0_spec, b0_spec, w1_spec, b1_spec, ws_spec],
            out_specs=row_out_spec,
            compiler_params=cparams,
            cost_estimate=cost,
        )(x2, w0, b0, w1, b1, ws)

    return out.reshape(*lead, size_out)


# ------------------------- pure-JAX reference (sanity) ----------------------- #

def _ref_resnet_block(x, params):
    w0, b0, w1, b1 = params["w0"], params["b0"], params["w1"], params["b1"]
    ws = params.get("ws", None)
    net = jnp.dot(jnp.maximum(x, 0.0), w0, precision=HIGHEST) + b0
    dx = jnp.dot(jnp.maximum(net, 0.0), w1, precision=HIGHEST) + b1
    x_s = jnp.dot(x, ws, precision=HIGHEST) if ws is not None else x
    return dx + x_s


# ---------------------------------- init ------------------------------------- #

def _init_params(key, size_in, size_out, size_h):
    """PyTorch nn.Linear init (uniform +-1/sqrt(fan_in)); weights stored as (in, out),
    biases pre-reshaped to (1, out) so the jitted forward does no parameter reshapes."""
    ks = jax.random.split(key, 5)

    def lin_w(k, fin, fout):
        bound = 1.0 / math.sqrt(fin)
        return jax.random.uniform(k, (fin, fout), jnp.float32, -bound, bound)

    def lin_b(k, fin, fout):
        bound = 1.0 / math.sqrt(fin)
        return jax.random.uniform(k, (1, fout), jnp.float32, -bound, bound)

    p = {
        "w0": lin_w(ks[0], size_in, size_h), "b0": lin_b(ks[1], size_in, size_h),
        "w1": lin_w(ks[2], size_h, size_out), "b1": lin_b(ks[3], size_h, size_out),
    }
    if size_in != size_out:
        p["ws"] = lin_w(ks[4], size_in, size_out)   # shortcut Linear, bias=False
    return p


# ---------------------------------- main -------------------------------------- #

if __name__ == "__main__":
    key = jax.random.PRNGKey(0)
    k_x1, k_p1, k_x2, k_p2 = jax.random.split(key, 4)

    # Case 1: size_in != size_out  ->  linear (bias-free) shortcut path.
    batch, seq, size_in, size_h, size_out = 2, 8, 4, 16, 32
    x1 = jax.random.normal(k_x1, (batch, seq, size_in), jnp.float32)
    p1 = _init_params(k_p1, size_in, size_out, size_h)
    out1 = jax.block_until_ready(resnet_block_fc(x1, p1))
    assert out1.shape == (batch, seq, size_out), out1.shape
    ref1 = _ref_resnet_block(x1, p1)
    assert jnp.allclose(out1, ref1, atol=1e-5, rtol=1e-5), float(jnp.max(jnp.abs(out1 - ref1)))

    # Case 2: size_in == size_out  ->  identity shortcut path (direct in-kernel add).
    size_in2 = size_out2 = 32
    x2 = jax.random.normal(k_x2, (batch, seq, size_in2), jnp.float32)
    p2 = _init_params(k_p2, size_in2, size_out2, size_h)
    out2 = jax.block_until_ready(resnet_block_fc(x2, p2))
    assert out2.shape == (batch, seq, size_out2), out2.shape
    ref2 = _ref_resnet_block(x2, p2)
    assert jnp.allclose(out2, ref2, atol=1e-5, rtol=1e-5), float(jnp.max(jnp.abs(out2 - ref2)))

    print("KERNEL_OK")
</pallas_src>

<mosaic_0001>
module attributes {stable_mosaic.version = 11 : i64} {
  func.func @_resnet_block_kernel_shortcut(%arg0: i32, %arg1: memref<16x4xf32, #tpu.memory_space<vmem>>, %arg2: memref<4x16xf32, #tpu.memory_space<vmem>>, %arg3: memref<1x16xf32, #tpu.memory_space<vmem>>, %arg4: memref<16x32xf32, #tpu.memory_space<vmem>>, %arg5: memref<1x32xf32, #tpu.memory_space<vmem>>, %arg6: memref<4x32xf32, #tpu.memory_space<vmem>>, %arg7: memref<16x32xf32, #tpu.memory_space<vmem>>) attributes {dimension_semantics = [#tpu.dimension_semantics<parallel>], iteration_bounds = array<i64: 1>, scalar_prefetch = 0 : i64, scratch_operands = 0 : i64, tpu.core_type = #tpu.core_type<tc>, window_params = [{transform_indices = @transform_0, window_bounds = array<i64: 16, 4>}, {pipeline_mode = #tpu.pipeline_mode<synchronous>, transform_indices = @transform_1, window_bounds = array<i64: 4, 16>}, {pipeline_mode = #tpu.pipeline_mode<synchronous>, transform_indices = @transform_2, window_bounds = array<i64: 1, 16>}, {pipeline_mode = #tpu.pipeline_mode<synchronous>, transform_indices = @transform_3, window_bounds = array<i64: 16, 32>}, {pipeline_mode = #tpu.pipeline_mode<synchronous>, transform_indices = @transform_4, window_bounds = array<i64: 1, 32>}, {pipeline_mode = #tpu.pipeline_mode<synchronous>, transform_indices = @transform_5, window_bounds = array<i64: 4, 32>}, {transform_indices = @transform_6, window_bounds = array<i64: 16, 32>}]} {
    %c0 = arith.constant 0 : index
    %c0_0 = arith.constant 0 : index
    %0 = vector.load %arg1[%c0, %c0_0] : memref<16x4xf32, #tpu.memory_space<vmem>>, vector<16x4xf32>
    %cst = arith.constant 0.000000e+00 : f32
    %1 = vector.broadcast %cst : f32 to vector<16x4xf32>
    %2 = arith.maximumf %0, %1 : vector<16x4xf32>
    %c0_1 = arith.constant 0 : index
    %c0_2 = arith.constant 0 : index
    %3 = vector.load %arg2[%c0_1, %c0_2] : memref<4x16xf32, #tpu.memory_space<vmem>>, vector<4x16xf32>
    %cst_3 = arith.constant dense<0.000000e+00> : vector<16x16xf32>
    %4 = tpu.matmul %2, %3, %cst_3 {dimension_numbers = #tpu.dot_dimension_numbers<[1], [0], [0], [1], [0, 0, 1, 1], [], []>, precision = #tpu.contract_precision<fp32>} : vector<16x4xf32>, vector<4x16xf32>, vector<16x16xf32> -> vector<16x16xf32>
    %c0_4 = arith.constant 0 : index
    %c0_5 = arith.constant 0 : index
    %5 = vector.load %arg3[%c0_4, %c0_5] : memref<1x16xf32, #tpu.memory_space<vmem>>, vector<1x16xf32>
    %6 = vector.broadcast %5 : vector<1x16xf32> to vector<16x16xf32>
    %7 = arith.addf %4, %6 : vector<16x16xf32>
    %cst_6 = arith.constant 0.000000e+00 : f32
    %8 = vector.broadcast %cst_6 : f32 to vector<16x16xf32>
    %9 = arith.maximumf %7, %8 : vector<16x16xf32>
    %c0_7 = arith.constant 0 : index
    %c0_8 = arith.constant 0 : index
    %10 = vector.load %arg4[%c0_7, %c0_8] : memref<16x32xf32, #tpu.memory_space<vmem>>, vector<16x32xf32>
    %cst_9 = arith.constant dense<0.000000e+00> : vector<16x32xf32>
    %11 = tpu.matmul %9, %10, %cst_9 {dimension_numbers = #tpu.dot_dimension_numbers<[1], [0], [0], [1], [0, 0, 1, 1], [], []>, precision = #tpu.contract_precision<fp32>} : vector<16x16xf32>, vector<16x32xf32>, vector<16x32xf32> -> vector<16x32xf32>
    %c0_10 = arith.constant 0 : index
    %c0_11 = arith.constant 0 : index
    %12 = vector.load %arg5[%c0_10, %c0_11] : memref<1x32xf32, #tpu.memory_space<vmem>>, vector<1x32xf32>
    %13 = vector.broadcast %12 : vector<1x32xf32> to vector<16x32xf32>
    %14 = arith.addf %11, %13 : vector<16x32xf32>
    %c0_12 = arith.constant 0 : index
    %c0_13 = arith.constant 0 : index
    %15 = vector.load %arg6[%c0_12, %c0_13] : memref<4x32xf32, #tpu.memory_space<vmem>>, vector<4x32xf32>
    %cst_14 = arith.constant dense<0.000000e+00> : vector<16x32xf32>
    %16 = tpu.matmul %0, %15, %cst_14 {dimension_numbers = #tpu.dot_dimension_numbers<[1], [0], [0], [1], [0, 0, 1, 1], [], []>, precision = #tpu.contract_precision<fp32>} : vector<16x4xf32>, vector<4x32xf32>, vector<16x32xf32> -> vector<16x32xf32>
    %17 = arith.addf %14, %16 : vector<16x32xf32>
    %c0_15 = arith.constant 0 : index
    %c0_16 = arith.constant 0 : index
    %18 = vector.load %arg7[%c0_15, %c0_16] : memref<16x32xf32, #tpu.memory_space<vmem>>, vector<16x32xf32>
    tpu.vector_store %arg7[%c0_15, %c0_16], %17 {strides = array<i32>} : memref<16x32xf32, #tpu.memory_space<vmem>>, vector<16x32xf32>,
    return
  }
  func.func @transform_0(%arg0: i32) -> (i32, i32) {
    %c0_i32 = arith.constant 0 : i32
    %c0_i32_0 = arith.constant 0 : i32
    return %arg0, %c0_i32 : i32, i32
  }
  func.func @transform_1(%arg0: i32) -> (i32, i32) {
    %c0_i32 = arith.constant 0 : i32
    %c0_i32_0 = arith.constant 0 : i32
    %c0_i32_1 = arith.constant 0 : i32
    return %c0_i32, %c0_i32_0 : i32, i32
  }
  func.func @transform_2(%arg0: i32) -> (i32, i32) {
    %c0_i32 = arith.constant 0 : i32
    %c0_i32_0 = arith.constant 0 : i32
    %c0_i32_1 = arith.constant 0 : i32
    return %c0_i32, %c0_i32_0 : i32, i32
  }
  func.func @transform_3(%arg0: i32) -> (i32, i32) {
    %c0_i32 = arith.constant 0 : i32
    %c0_i32_0 = arith.constant 0 : i32
    %c0_i32_1 = arith.constant 0 : i32
    return %c0_i32, %c0_i32_0 : i32, i32
  }
  func.func @transform_4(%arg0: i32) -> (i32, i32) {
    %c0_i32 = arith.constant 0 : i32
    %c0_i32_0 = arith.constant 0 : i32
    %c0_i32_1 = arith.constant 0 : i32
    return %c0_i32, %c0_i32_0 : i32, i32
  }
  func.func @transform_5(%arg0: i32) -> (i32, i32) {
    %c0_i32 = arith.constant 0 : i32
    %c0_i32_0 = arith.constant 0 : i32
    %c0_i32_1 = arith.constant 0 : i32
    return %c0_i32, %c0_i32_0 : i32, i32
  }
  func.func @transform_6(%arg0: i32) -> (i32, i32) {
    %c0_i32 = arith.constant 0 : i32
    %c0_i32_0 = arith.constant 0 : i32
    return %arg0, %c0_i32 : i32, i32
  }
}

</mosaic_0001>

<bundles_post_ra>
// kernel: resnet_block_fc.1
= control target key start
LH: loop header
LB: loop body
LE: loop exit
PB: predicated region body
PF: predicated region fallthrough
CT: control target
= control target key end

     0   :  { %vm40_vm0 = vcmask 1043456   ;;  %vm33_vm1 = vcmask 31744   ;;  %s752_s0 = inlined_call_operand.vmem [shape: f32[16,4], index: 0, kind: input, shape index: {}]   ;;  %s753_s1 = inlined_call_operand.vmem [shape: f32[4,16], index: 1, kind: input, shape index: {}]   ;;  %s754_s2 = inlined_call_operand.vmem [shape: f32[1,16], index: 2, kind: input, shape index: {}]   ;;  %s755_s3 = inlined_call_operand.vmem [shape: f32[16,32], index: 3, kind: input, shape index: {}]   ;;  %s756_s4 = inlined_call_operand.vmem [shape: f32[1,32], index: 4, kind: input, shape index: {}]   ;;  %s757_s5 = inlined_call_operand.vmem [shape: f32[4,32], index: 5, kind: input, shape index: {}]   ;;  %s758_s6 = inlined_call_operand.hbm [shape: f32[16,32], index: 6, kind: output, shape index: {}]  }
   0x1   :  { %v28_v0 = vld [vmem:[%s753_s1] sm:$0xf]  ;;  %v713_v1 = vld [vmem:[%s752_s0 + $0x8] sm:$0xff] }
   0x2   :  { %v718_v2 = vld [vmem:[%s752_s0] sm:$0xff]  ;;  %v42_v3 = vsel %vm40_vm0, %v28_v0, 0  ;;  %v27_v4 = vmax.f32 %v713_v1, 0.0 }
   0x3   :  { %v26_v5 = vmax.f32 %v718_v2, 0.0  ;;  %v59_v6 = vand.u32 4294901760, %v42_v3 }
   0x4   :  { %v38_v7 = vsel %vm33_vm1, %v27_v4, 0 }
   0x5   :  { %v35_v8 = vsel %vm33_vm1, %v26_v5, 0 }
   0x6   :  { %11 = vsyncpa [#allocation3], 0  ;;  %636 = vmatpush.msra.mxu2 %v59_v6  ;;  %v69_v9 = vand.u32 4294901760, %v38_v7  ;;  %v94_v10 = vsub.f32 %v42_v3, %v59_v6  ;;  %v61_v11 = vand.u32 4294901760, %v35_v8  ;;  %60 = vmatpush.msra.mxu0 %v59_v6  ;;  %v224_v23 = vld [vmem:[%s755_s3 + $0x8] sm:$0xff]  ;;  %v223_v25 = vld [vmem:[%s755_s3] sm:$0xff] }
   0x7   :  { %v250_v24 = vand.u32 4294901760, %v224_v23  ;;  %v252_v27 = vand.u32 4294901760, %v223_v25  ;;  %v641_v36 = vld [vmem:[%s754_s2] ss:$0 sm:$0xff]  ;;  %vm229_vm2 = vcmask 130048   ;;  %v428_v61 = vsel %vm33_vm1, %v718_v2, 0 }
   0x8   :  { %v70_v12 = vsub.f32 %v38_v7, %v69_v9  ;;  %125 = vmatpush.msrb.mxu2 %v94_v10  ;;  %v95_v13 = vand.u32 4294901760, %v94_v10  ;;  %v62_v14 = vsub.f32 %v35_v8, %v61_v11  ;;  %v426_v42 = vld [vmem:[%s757_s5] sm:$0xf]  ;;  %v453_v5 = vand.u32 4294901760, %v428_v61  ;;  %s624_s11 = sshll.u32 %s758_s6, 4  ;;  %s670_s12 = smov 128   ;;  %s625_s11 = int_to_ptr.hbm [resolvable:$true] %s624_s11 }
   0x9   :  { %v286_v26 = vsub.f32 %v224_v23, %v250_v24  ;;  %v292_v29 = vsub.f32 %v223_v25, %v252_v27  ;;  %v434_v44 = vsel %vm40_vm0, %v426_v42, 0  ;;  %v431_v2 = vsel %vm33_vm1, %v713_v1, 0  ;;  %s671_s13 = smov 8  }
   0xa   :  { %v71_v15 = vand.u32 4294901760, %v70_v12  ;;  %v96_v16 = vsub.f32 %v94_v10, %v95_v13  ;;  %v63_v17 = vand.u32 4294901760, %v62_v14  ;;  %185 = vmatpush.msrb.mxu0 %v95_v13  ;;  %v451_v47 = vand.u32 4294901760, %v434_v44 }
   0xb   :  { %v287_v28 = vand.u32 4294901760, %v286_v26  ;;  %v293_v31 = vand.u32 4294901760, %v292_v29  ;;  %vm615_vm3 = vcmask 261120  }
   0xc   :  { %v72_v18 = vsub.f32 %v70_v12, %v71_v15  ;;  %v97_v19 = vand.u32 4294901760, %v96_v16  ;;  %v64_v20 = vsub.f32 %v62_v14, %v63_v17  ;;  %v486_v50 = vsub.f32 %v434_v44, %v451_v47 }
   0xd   :  { %v288_v30 = vsub.f32 %v286_v26, %v287_v28  ;;  %v294_v33 = vsub.f32 %v292_v29, %v293_v31 }
   0xe   :  { %v73_v21 = vand.u32 4294901760, %v72_v18  ;;  %637 = vmatpush.msra.mxu3 %v97_v19  ;;  %v65_v22 = vand.u32 4294901760, %v64_v20  ;;  %98 = vmatpush.msra.mxu1 %v97_v19  ;;  %v487_v53 = vand.u32 4294901760, %v486_v50  ;;  %v461_v19 = vand.u32 4294901760, %v431_v2 }
   0xf   :  { %104 = vmatmul.f32.vlgmr.msra.gmra.mxu3 %v69_v9  ;;  %100 = vmatmul.f32.vlgmr.msra.gmra.mxu1 %v61_v11  ;;  %v289_v32 = vand.u32 4294901760, %v288_v30  ;;  %v295_v34 = vand.u32 4294901760, %v294_v33 }
  0x10   :  { %74 = vmatmul.f32.vlgmr.msra.gmra.mxu2 %v73_v21  ;;  %153 = vmatpush.msrb.mxu3 %v59_v6  ;;  %v488_v55 = vsub.f32 %v486_v50, %v487_v53  ;;  %v462_v23 = vsub.f32 %v431_v2, %v461_v19 }
  0x11   :  { %66 = vmatmul.f32.vlgmr.msra.gmra.mxu0 %v65_v22  ;;  %211 = vmatpush.msrb.mxu1 %v59_v6 }
  0x12   :  { %251 = vmatpush.msra.mxu2 %v250_v24  ;;  %322 = vmatpush.msra.mxu0 %v286_v26  ;;  %v489_v60 = vand.u32 4294901760, %v488_v55  ;;  %v463_v26 = vand.u32 4294901760, %v462_v23 }
  0x13   :  { %352 = vmatpush.msra.mxu1 %v250_v24  ;;  %290 = vmatpush.msra.mxu3 %v289_v32 }
  0x14   :  { %253 = vmatpush.msra.mxu2 %v252_v27  ;;  %325 = vmatpush.msra.mxu0 %v292_v29 }
  0x15   :  { %354 = vmatpush.msra.mxu1 %v252_v27  ;;  %296 = vmatpush.msra.mxu3 %v295_v34 }
  0x17   :  { %157 = vmatmul.f32.vlgmr.msrb.gmra.mxu3 %v63_v17  ;;  %213 = vmatmul.f32.vlgmr.msrb.gmra.mxu1 %v61_v11 }
  0x18   :  { %128 = vmatmul.f32.vlgmr.msrb.gmra.mxu2 %v62_v14  ;;  %414 = vmatpush.msrb.mxu3 %v250_v24 }
  0x19   :  { %187 = vmatmul.f32.vlgmr.msrb.gmra.mxu0 %v61_v11  ;;  %385 = vmatpush.msrb.mxu2 %v287_v28  ;;  %v454_v11 = vsub.f32 %v428_v61, %v453_v5 }
  0x1a   :  { %416 = vmatpush.msrb.mxu3 %v252_v27  ;;  %452 = vmatpush.msrb.mxu0 %v451_v47  ;;  %v464_v27 = vsub.f32 %v462_v23, %v463_v26 }
  0x1b   :  { %389 = vmatpush.msrb.mxu2 %v293_v31  ;;  %490 = vmatpush.msrb.mxu1 %v489_v60  ;;  %v455_v18 = vand.u32 4294901760, %v454_v11 }
  0x1c   :  { %v465_v28 = vand.u32 4294901760, %v464_v27 }
  0x1d   :  { %v456_v22 = vsub.f32 %v454_v11, %v455_v18 }
  0x1f   :  { %163 = vmatmul.f32.gmra.mxu3 %v71_v15  ;;  %217 = vmatmul.f32.gmra.mxu1 %v69_v9  ;;  %v457_v25 = vand.u32 4294901760, %v456_v22 }
  0x20   :  { %133 = vmatmul.f32.gmra.mxu2 %v70_v12 }
  0x21   :  { %191 = vmatmul.f32.gmra.mxu0 %v69_v9 }
  0x8c   :  { %v101_v39 = vpop.f32.mrf.mxu1 }
  0x8e   :  { %v67_v35 = vpop.f32.mrf.mxu0 }
  0x8f   :  { %v68_v40 = vadd.f32 %v641_v36, %v67_v35 }
  0x91   :  { %v102_v41 = vadd.f32 %v101_v39, %v68_v40 }
  0x92   :  { %v105_v37 = vpop.f32.mrf.mxu3 }
  0x93   :  { %v75_v38 = vpop.f32.mrf.mxu2 }
  0x94   :  { %v214_v49 = vpop.f32.mrf.mxu1  ;;  %v76_v51 = vadd.f32 %v641_v36, %v75_v38 }
  0x96   :  { %v188_v46 = vpop.f32.mrf.mxu0  ;;  %v106_v56 = vadd.f32 %v105_v37, %v76_v51 }
  0x9a   :  { %v158_v43 = vpop.f32.mrf.mxu3 }
  0x9b   :  { %v129_v45 = vpop.f32.mrf.mxu2 }
  0x9c   :  { %v130_v48 = vadd.f32 %v129_v45, %v102_v41  ;;  %v218_v7 = vpop.f32.mrf.mxu1  ;;  %v642_v41 = vld [vmem:[%s756_s4] ss:$0 sm:$0xff]  ;;  %s669_s4 = smov [#allocation2]  }
  0x9d   :  { %s622_s8 = sshll.u32 %s669_s4, 4  ;;  %s623_s8 = int_to_ptr.vmem [resolvable:$true] %s622_s8 }
  0x9e   :  { %v159_v52 = vadd.f32 %v158_v43, %v130_v48  ;;  %v192_v0 = vpop.f32.mrf.mxu0 }
  0xa0   :  { %v189_v54 = vadd.f32 %v188_v46, %v159_v52 }
  0xa2   :  { %v215_v57 = vadd.f32 %v214_v49, %v189_v54  ;;  %v164_v59 = vpop.f32.mrf.mxu3 }
  0xa3   :  { %v134_v58 = vpop.f32.mrf.mxu2 }
  0xa4   :  { %v221_v62 = vmax.f32 %v215_v57, 0.0  ;;  %v135_v63 = vadd.f32 %v134_v58, %v106_v56 }
  0xa6   :  { %v231_v3 = vsel %vm229_vm2, %v221_v62, 0  ;;  %v165_v4 = vadd.f32 %v164_v59, %v135_v63 }
  0xa7   :  { %v254_v6 = vand.u32 4294901760, %v231_v3 }
  0xa8   :  { %v193_v8 = vadd.f32 %v192_v0, %v165_v4 }
  0xa9   :  { %v255_v9 = vsub.f32 %v231_v3, %v254_v6  ;;  %298 = vmatmul.f32.vlgmr.msra.gmra.mxu3 %v254_v6 }
  0xaa   :  { %v219_v10 = vadd.f32 %v218_v7, %v193_v8  ;;  %545 = vmatpush.msra.mxu3 %v451_v47 }
  0xab   :  { %328 = vmatmul.f32.vlgmr.msra.gmra.mxu0 %v255_v9  ;;  %v256_v12 = vand.u32 4294901760, %v255_v9 }
  0xac   :  { %v222_v13 = vmax.f32 %v219_v10, 0.0  ;;  %577 = vmatpush.msra.mxu0 %v487_v53 }
  0xad   :  { %358 = vmatmul.f32.vlgmr.msra.gmra.mxu1 %v256_v12  ;;  %v257_v14 = vsub.f32 %v255_v9, %v256_v12 }
  0xae   :  { %v234_v15 = vsel %vm229_vm2, %v222_v13, 0  ;;  %603 = vmatpush.msra.mxu1 %v451_v47 }
  0xaf   :  { %v262_v16 = vand.u32 4294901760, %v234_v15  ;;  %v258_v17 = vand.u32 4294901760, %v257_v14 }
  0xb1   :  { %259 = vmatmul.f32.vlgmr.msra.gmra.mxu2 %v258_v17  ;;  %302 = vmatmul.f32.gmra.mxu3 %v262_v16  ;;  %v263_v20 = vsub.f32 %v234_v15, %v262_v16 }
  0xb2   :  { %517 = vmatpush.msra.mxu2 %v486_v50 }
  0xb3   :  { %333 = vmatmul.f32.gmra.mxu0 %v263_v20  ;;  %v264_v21 = vand.u32 4294901760, %v263_v20 }
  0xb5   :  { %364 = vmatmul.f32.gmra.mxu1 %v264_v21  ;;  %v265_v24 = vsub.f32 %v263_v20, %v264_v21 }
  0xb7   :  { %v266_v1 = vand.u32 4294901760, %v265_v24 }
  0xb9   :  { %267 = vmatmul.f32.gmra.mxu2 %v266_v1  ;;  %418 = vmatmul.f32.vlgmr.msrb.gmra.mxu3 %v254_v6 }
  0xbb   :  { %458 = vmatmul.f32.vlgmr.msrb.gmra.mxu0 %v457_v25 }
  0xbd   :  { %492 = vmatmul.f32.vlgmr.msrb.gmra.mxu1 %v453_v5 }
  0xc1   :  { %391 = vmatmul.f32.vlgmr.msrb.gmra.mxu2 %v254_v6  ;;  %422 = vmatmul.f32.gmra.mxu3 %v262_v16 }
  0xc3   :  { %466 = vmatmul.f32.gmra.mxu0 %v465_v28 }
  0xc5   :  { %496 = vmatmul.f32.gmra.mxu1 %v461_v19 }
  0xc9   :  { %395 = vmatmul.f32.gmra.mxu2 %v262_v16  ;;  %549 = vmatmul.f32.vlgmr.msra.gmra.mxu3 %v455_v18 }
  0xcb   :  { %579 = vmatmul.f32.vlgmr.msra.gmra.mxu0 %v453_v5 }
  0xcd   :  { %605 = vmatmul.f32.vlgmr.msra.gmra.mxu1 %v453_v5 }
  0xd1   :  { %520 = vmatmul.f32.vlgmr.msra.gmra.mxu2 %v454_v11  ;;  %555 = vmatmul.f32.gmra.mxu3 %v463_v26 }
  0xd3   :  { %583 = vmatmul.f32.gmra.mxu0 %v461_v19 }
  0xd5   :  { %609 = vmatmul.f32.gmra.mxu1 %v461_v19 }
  0xd9   :  { %525 = vmatmul.f32.gmra.mxu2 %v462_v23 }
 0x128   :  { %v329_v30 = vpop.f32.mrf.mxu0 }
 0x12a   :  { %v359_v31 = vpop.f32.mrf.mxu1 }
 0x12c   :  { %v299_v29 = vpop.f32.mrf.mxu3 }
 0x130   :  { %v334_v34 = vpop.f32.mrf.mxu0 }
 0x132   :  { %v365_v35 = vpop.f32.mrf.mxu1 }
 0x134   :  { %v260_v32 = vpop.f32.mrf.mxu2  ;;  %v303_v33 = vpop.f32.mrf.mxu3 }
 0x135   :  { %v261_v42 = vadd.f32 %v642_v41, %v260_v32 }
 0x137   :  { %v300_v46 = vadd.f32 %v299_v29, %v261_v42 }
 0x138   :  { %v459_v38 = vpop.f32.mrf.mxu0 }
 0x139   :  { %v330_v49 = vadd.f32 %v329_v30, %v300_v46 }
 0x13a   :  { %v493_v40 = vpop.f32.mrf.mxu1 }
 0x13b   :  { %v494_v51 = vadd.f32 %v493_v40, %v459_v38  ;;  %v360_v55 = vadd.f32 %v359_v31, %v330_v49 }
 0x13c   :  { %v268_v36 = vpop.f32.mrf.mxu2  ;;  %v419_v37 = vpop.f32.mrf.mxu3 }
 0x13d   :  { %v269_v48 = vadd.f32 %v642_v41, %v268_v36 }
 0x13f   :  { %v304_v54 = vadd.f32 %v303_v33, %v269_v48 }
 0x140   :  { %v467_v44 = vpop.f32.mrf.mxu0 }
 0x141   :  { %v335_v60 = vadd.f32 %v334_v34, %v304_v54 }
 0x142   :  { %v497_v47 = vpop.f32.mrf.mxu1 }
 0x143   :  { %v498_v63 = vadd.f32 %v497_v47, %v467_v44  ;;  %v366_v5 = vadd.f32 %v365_v35, %v335_v60 }
 0x144   :  { %v392_v39 = vpop.f32.mrf.mxu2  ;;  %v423_v43 = vpop.f32.mrf.mxu3 }
 0x145   :  { %v393_v58 = vadd.f32 %v392_v39, %v360_v55 }
 0x147   :  { %v420_v62 = vadd.f32 %v419_v37, %v393_v58 }
 0x148   :  { %v580_v53 = vpop.f32.mrf.mxu0 }
 0x14a   :  { %v606_v57 = vpop.f32.mrf.mxu1 }
 0x14c   :  { %v396_v45 = vpop.f32.mrf.mxu2  ;;  %v550_v50 = vpop.f32.mrf.mxu3 }
 0x14d   :  { %v397_v9 = vadd.f32 %v396_v45, %v366_v5 }
 0x14f   :  { %v424_v13 = vadd.f32 %v423_v43, %v397_v9 }
 0x150   :  { %v584_v8 = vpop.f32.mrf.mxu0 }
 0x152   :  { %v610_v11 = vpop.f32.mrf.mxu1 }
 0x154   :  { %v521_v52 = vpop.f32.mrf.mxu2  ;;  %v556_v4 = vpop.f32.mrf.mxu3 }
 0x155   :  { %v522_v56 = vadd.f32 %v521_v52, %v494_v51 }
 0x157   :  { %v551_v59 = vadd.f32 %v550_v50, %v522_v56 }
 0x159   :  { %v581_v61 = vadd.f32 %v580_v53, %v551_v59 }
 0x15b   :  { %v607_v0 = vadd.f32 %v606_v57, %v581_v61 }
 0x15c   :  { %v526_v3 = vpop.f32.mrf.mxu2 }
 0x15d   :  { %v613_v6 = vadd.f32 %v607_v0, %v420_v62  ;;  %v527_v7 = vadd.f32 %v526_v3, %v498_v63 }
 0x15f   :  { %616 = vst.msk [vmem:[#allocation2] sm:$0xff] %vm615_vm3, %v613_v6  ;;  %v557_v10 = vadd.f32 %v556_v4, %v527_v7 }
 0x161   :  { %v585_v12 = vadd.f32 %v584_v8, %v557_v10 }
 0x163   :  { %v611_v2 = vadd.f32 %v610_v11, %v585_v12 }
 0x165   :  { %v614_v14 = vadd.f32 %v611_v2, %v424_v13 }
 0x167   :  { %617 = vst.msk [vmem:[#allocation2 + $0x8] sm:$0xff] %vm615_vm3, %v614_v14 }
 0x168   :  { %630 = dma.vmem_to_hbm [thread:$0]  %s623_s8, 256, %s625_s11, [#allocation3], %s670_s12, %s670_s12, %s671_s13  }
 0x169   :  { %667 = dma.done.wait [#allocation3], 256  }
 0x16a   :  { %668 = vsyncadd [#allocation3], 4294967040 }
 0x16b   :  { %635 = vsyncpa [#allocation3], 1 }

</bundles_post_ra>
